<compile_context>
chip_gen: v5e
topology: v5e:2x2
jax: 0.10.0
libtpu: 0.0.40
codegen_flags: <defaults>
</compile_context>

<pallas_src>
import functools

import jax
import jax.numpy as jnp
from jax import lax
from jax.experimental import pallas as pl
from jax.experimental.pallas import tpu as pltpu


def _round_up(x, m):
    return ((x + m - 1) // m) * m


def _tpu_config():
    """Best-effort hardware detection (wrapper-time, outside any trace).

    Returns (use_bf16_epilogue, num_tensorcores, batch_tile_cap).
      * bf16 epilogue only on v6/v7 (native bf16 VALU); v5e's VPU has no bf16
        arithmetic and is MXU-bound anyway, so its epilogue stays f32.
      * v7x has 2 TensorCores per chip -> keep >= 2 grid steps so
        dimension_semantics=("parallel",) can shard the batch across them.
      * Tile cap: 4096 lanes on v6e/v7x, 2048 on v5e/unknown.
    """
    kind = ""
    try:
        kind = jax.devices()[0].device_kind.lower()
    except Exception:  # detection is best-effort; fall back to safe defaults
        pass
    is_v6 = "v6" in kind
    is_v7 = "v7" in kind
    bf16_epilogue = is_v6 or is_v7
    num_tc = 2 if is_v7 else 1
    tile_cap = 4096 if (is_v6 or is_v7) else 2048
    return bf16_epilogue, num_tc, tile_cap


def _mlp_kernel(x_ref,
                w1_ref, b1_ref,
                w2_ref, b2_ref,
                w3_ref, b3_ref,
                w4_ref, b4_ref,
                o_ref, *, epi_dtype):
    """One batch tile; feature-major inside the kernel (batch on lanes).

    x_ref : (TILE_B, C) f32  -- batch-major straight from HBM.
    wN_ref: (out, in) bf16   -- PyTorch layout, resident across tiles.
    bN_ref: (out, 1) epi_dtype; w4_ref: (128, 1) f32; b4_ref: (1, 1) f32 SMEM.
    o_ref : (1, TILE_B) f32  -- lane-dense output row.
    """
    x = x_ref[...].astype(jnp.bfloat16)                       # (TILE_B, C)

    # Layer 1: (d1, C) . (TILE_B, C)^T -> (d1, TILE_B).  Transposed-RHS MXU
    # matmul (same form as q @ k^T in flash attention); no explicit transpose
    # and no wrapper-side relayout pass.
    h = lax.dot_general(w1_ref[...], x,
                        dimension_numbers=(((1,), (1,)), ((), ())),
                        preferred_element_type=jnp.float32)
    h = jnp.maximum(h.astype(epi_dtype) + b1_ref[...], 0.0)

    # Layer 2: (256, 128) @ (128, TILE_B) -> (256, TILE_B).
    h = jnp.dot(w2_ref[...], h.astype(jnp.bfloat16),
                preferred_element_type=jnp.float32)
    h = jnp.maximum(h.astype(epi_dtype) + b2_ref[...], 0.0)

    # Layer 3: (128, 256) @ (256, TILE_B) -> (128, TILE_B).
    h = jnp.dot(w3_ref[...], h.astype(jnp.bfloat16),
                preferred_element_type=jnp.float32)
    h = jnp.maximum(h.astype(epi_dtype) + b3_ref[...], 0.0)

    # Layer 4 (128 -> 1): VPU multiply + sublane reduction in f32 instead of
    # an N=1 MXU matmul; result is already lane-dense (1, TILE_B).
    z = jnp.sum(h.astype(jnp.float32) * w4_ref[...],
                axis=0, keepdims=True) + b4_ref[0, 0]
    o_ref[...] = jax.nn.sigmoid(z)


def net_d_forward(x, params):
    """Run the net_D classifier MLP with a batch-tiled Pallas kernel.

    x: (B, num_classes) float32
    params: dict with wN in PyTorch (out, in) layout and bN of shape (out,).
    Returns (B, 1) float32.
    """
    B, C = x.shape
    d1 = params["w1"].shape[0]   # 128
    d2 = params["w2"].shape[0]   # 256
    d3 = params["w3"].shape[0]   # 128

    bf16_epi, num_tc, tile_cap = _tpu_config()
    epi_dtype = jnp.bfloat16 if bf16_epi else jnp.float32

    # ---- batch tiling ----------------------------------------------------
    b128 = _round_up(max(B, 1), 128)          # lane-dense 128-multiple tiles
    tile_b = min(tile_cap, b128)
    if num_tc > 1 and b128 > 128:
        # Ensure at least `num_tc` grid steps so the "parallel" axis can be
        # sharded across both v7x TensorCores for mid-size batches.
        tile_b = min(tile_b, _round_up(-(-b128 // num_tc), 128))
    b_pad = _round_up(B, tile_b)
    num_tiles = b_pad // tile_b

    # x stays batch-major f32 in HBM (no transpose/cast pass); only the
    # ragged batch remainder is zero-padded so every tile is full.
    if b_pad != B:
        x = jnp.pad(x, ((0, b_pad - B), (0, 0)))

    w1 = params["w1"].astype(jnp.bfloat16)                 # (d1, C)
    w2 = params["w2"].astype(jnp.bfloat16)                 # (d2, d1)
    w3 = params["w3"].astype(jnp.bfloat16)                 # (d3, d2)
    w4 = params["w4"].astype(jnp.float32).T                # (d3, 1) VPU path
    b1 = params["b1"].astype(epi_dtype)[:, None]           # (d1, 1)
    b2 = params["b2"].astype(epi_dtype)[:, None]           # (d2, 1)
    b3 = params["b3"].astype(epi_dtype)[:, None]           # (d3, 1)
    b4 = params["b4"].astype(jnp.float32).reshape(1, 1)    # (1, 1) scalar

    in_specs = [
        pl.BlockSpec((tile_b, C), lambda i: (i, 0)),        # x batch tile
        pl.BlockSpec((d1, C), lambda i: (0, 0)),            # w1 (resident)
        pl.BlockSpec((d1, 1), lambda i: (0, 0)),            # b1
        pl.BlockSpec((d2, d1), lambda i: (0, 0)),           # w2
        pl.BlockSpec((d2, 1), lambda i: (0, 0)),            # b2
        pl.BlockSpec((d3, d2), lambda i: (0, 0)),           # w3
        pl.BlockSpec((d3, 1), lambda i: (0, 0)),            # b3
        pl.BlockSpec((d3, 1), lambda i: (0, 0)),            # w4 column
        pl.BlockSpec(memory_space=pltpu.MemorySpace.SMEM),  # b4 scalar
    ]
    out_spec = pl.BlockSpec((1, tile_b), lambda i: (0, i))  # lane-dense out

    flops = 2 * b_pad * (C * d1 + d1 * d2 + d2 * d3 + d3)
    bytes_accessed = (
        b_pad * C * 4                                  # f32 activations in
        + (w1.size + w2.size + w3.size) * 2            # bf16 weights
        + w4.size * 4 + (d1 + d2 + d3 + 1) * 4         # f32 w4 col + biases
        + b_pad * 4                                    # f32 output
    )
    cost = pl.CostEstimate(flops=int(flops),
                           transcendentals=int(b_pad),
                           bytes_accessed=int(bytes_accessed))

    kernel = functools.partial(_mlp_kernel, epi_dtype=epi_dtype)

    out = pl.pallas_call(
        kernel,
        out_shape=jax.ShapeDtypeStruct((1, b_pad), jnp.float32),
        grid=(num_tiles,),
        in_specs=in_specs,
        out_specs=out_spec,
        compiler_params=pltpu.CompilerParams(
            dimension_semantics=("parallel",),
            # Explicit scoped-VMEM limit: large tiles (2-4K lanes) exceed
            # v5e's 16 MiB default; 48 MiB fits under v7x's 64 MiB physical.
            vmem_limit_bytes=48 * 1024 * 1024),
        cost_estimate=cost,
    )(x, w1, b1, w2, b2, w3, b3, w4, b4)

    return out[0, :B].reshape(B, 1)


def init_params(key, num_classes=10):
    """Mirror net_D._initialize_weights: Linear weight ~ N(0, 0.01), bias = 0.
    Weights are kept in PyTorch's (out_features, in_features) layout."""
    dims = [(128, num_classes), (256, 128), (128, 256), (1, 128)]
    params = {}
    for i, (dout, din) in enumerate(dims, start=1):
        key, sub = jax.random.split(key)
        params[f"w{i}"] = 0.01 * jax.random.normal(sub, (dout, din),
                                                   dtype=jnp.float32)
        params[f"b{i}"] = jnp.zeros((dout,), dtype=jnp.float32)
    return params


def _reference_forward(x, p, epi_dtype):
    """Pure-JAX reference mirroring the kernel's precision policy
    (bf16 MXU inputs, f32 accumulation, epilogue in `epi_dtype`,
    final layer + sigmoid in f32)."""
    h = jnp.dot(x.astype(jnp.bfloat16), p["w1"].astype(jnp.bfloat16).T,
                preferred_element_type=jnp.float32)
    h = jnp.maximum(h.astype(epi_dtype) + p["b1"].astype(epi_dtype)[None, :], 0.0)
    h = jnp.dot(h.astype(jnp.bfloat16), p["w2"].astype(jnp.bfloat16).T,
                preferred_element_type=jnp.float32)
    h = jnp.maximum(h.astype(epi_dtype) + p["b2"].astype(epi_dtype)[None, :], 0.0)
    h = jnp.dot(h.astype(jnp.bfloat16), p["w3"].astype(jnp.bfloat16).T,
                preferred_element_type=jnp.float32)
    h = jnp.maximum(h.astype(epi_dtype) + p["b3"].astype(epi_dtype)[None, :], 0.0)
    z = jnp.dot(h.astype(jnp.float32), p["w4"].astype(jnp.float32).T) + p["b4"][None, :]
    return jax.nn.sigmoid(z)


if __name__ == "__main__":
    key = jax.random.PRNGKey(0)
    k_param, k_x, k_x2 = jax.random.split(key, 3)

    num_classes = 10
    batch = 8
    params = init_params(k_param, num_classes=num_classes)
    epi_dtype = jnp.bfloat16 if _tpu_config()[0] else jnp.float32

    # Small-shape check (single padded tile).
    x = jax.random.normal(k_x, (batch, num_classes), dtype=jnp.float32)
    out = jax.block_until_ready(net_d_forward(x, params))
    ref = _reference_forward(x, params, epi_dtype)
    assert out.shape == (batch, 1)
    assert jnp.allclose(out, ref, atol=1e-3, rtol=1e-3), "mismatch vs reference"

    # Larger batch exercises the multi-tile grid + remainder padding path.
    x_big = jax.random.normal(k_x2, (1000, num_classes), dtype=jnp.float32)
    out_big = jax.block_until_ready(net_d_forward(x_big, params))
    ref_big = _reference_forward(x_big, params, epi_dtype)
    assert out_big.shape == (1000, 1)
    assert jnp.allclose(out_big, ref_big, atol=1e-3, rtol=1e-3), "mismatch (big batch)"

    print("KERNEL_OK")
</pallas_src>

<mosaic_0001>
module attributes {stable_mosaic.version = 11 : i64} {
  func.func @_mlp_kernel(%arg0: i32, %arg1: memref<128x10xf32, #tpu.memory_space<vmem>>, %arg2: memref<128x10xbf16, #tpu.memory_space<vmem>>, %arg3: memref<128x1xf32, #tpu.memory_space<vmem>>, %arg4: memref<256x128xbf16, #tpu.memory_space<vmem>>, %arg5: memref<256x1xf32, #tpu.memory_space<vmem>>, %arg6: memref<128x256xbf16, #tpu.memory_space<vmem>>, %arg7: memref<128x1xf32, #tpu.memory_space<vmem>>, %arg8: memref<128x1xf32, #tpu.memory_space<vmem>>, %arg9: memref<1x1xf32, #tpu.memory_space<smem>>, %arg10: memref<1x128xf32, #tpu.memory_space<vmem>>) attributes {dimension_semantics = [#tpu.dimension_semantics<parallel>], iteration_bounds = array<i64: 1>, scalar_prefetch = 0 : i64, scratch_operands = 0 : i64, tpu.core_type = #tpu.core_type<tc>, window_params = [{transform_indices = @transform_0, window_bounds = array<i64: 128, 10>}, {pipeline_mode = #tpu.pipeline_mode<synchronous>, transform_indices = @transform_1, window_bounds = array<i64: 128, 10>}, {pipeline_mode = #tpu.pipeline_mode<synchronous>, transform_indices = @transform_2, window_bounds = array<i64: 128, 1>}, {pipeline_mode = #tpu.pipeline_mode<synchronous>, transform_indices = @transform_3, window_bounds = array<i64: 256, 128>}, {pipeline_mode = #tpu.pipeline_mode<synchronous>, transform_indices = @transform_4, window_bounds = array<i64: 256, 1>}, {pipeline_mode = #tpu.pipeline_mode<synchronous>, transform_indices = @transform_5, window_bounds = array<i64: 128, 256>}, {pipeline_mode = #tpu.pipeline_mode<synchronous>, transform_indices = @transform_6, window_bounds = array<i64: 128, 1>}, {pipeline_mode = #tpu.pipeline_mode<synchronous>, transform_indices = @transform_7, window_bounds = array<i64: 128, 1>}, {transform_indices = @transform_8, window_bounds = array<i64: 1, 1>}, {transform_indices = @transform_9, window_bounds = array<i64: 1, 128>}]} {
    %c0 = arith.constant 0 : index
    %c0_0 = arith.constant 0 : index
    %0 = vector.load %arg1[%c0, %c0_0] : memref<128x10xf32, #tpu.memory_space<vmem>>, vector<128x10xf32>
    %1 = arith.truncf %0 : vector<128x10xf32> to vector<128x10xbf16>
    %c0_1 = arith.constant 0 : index
    %c0_2 = arith.constant 0 : index
    %2 = vector.load %arg2[%c0_1, %c0_2] : memref<128x10xbf16, #tpu.memory_space<vmem>>, vector<128x10xbf16>
    %cst = arith.constant dense<0.000000e+00> : vector<128x128xf32>
    %3 = tpu.matmul %2, %1, %cst {dimension_numbers = #tpu.dot_dimension_numbers<[1], [1], [0], [0], [0, 0, 1, 0], [], []>} : vector<128x10xbf16>, vector<128x10xbf16>, vector<128x128xf32> -> vector<128x128xf32>
    %c0_3 = arith.constant 0 : index
    %c0_4 = arith.constant 0 : index
    %4 = vector.load %arg3[%c0_3, %c0_4] : memref<128x1xf32, #tpu.memory_space<vmem>>, vector<128x1xf32>
    %5 = vector.broadcast %4 : vector<128x1xf32> to vector<128x128xf32>
    %6 = arith.addf %3, %5 : vector<128x128xf32>
    %cst_5 = arith.constant 0.000000e+00 : f32
    %7 = vector.broadcast %cst_5 : f32 to vector<128x128xf32>
    %8 = arith.maximumf %6, %7 : vector<128x128xf32>
    %c0_6 = arith.constant 0 : index
    %c0_7 = arith.constant 0 : index
    %9 = vector.load %arg4[%c0_6, %c0_7] : memref<256x128xbf16, #tpu.memory_space<vmem>>, vector<256x128xbf16>
    %10 = arith.truncf %8 : vector<128x128xf32> to vector<128x128xbf16>
    %cst_8 = arith.constant dense<0.000000e+00> : vector<256x128xf32>
    %11 = tpu.matmul %9, %10, %cst_8 {dimension_numbers = #tpu.dot_dimension_numbers<[1], [0], [0], [1], [0, 0, 1, 1], [], []>} : vector<256x128xbf16>, vector<128x128xbf16>, vector<256x128xf32> -> vector<256x128xf32>
    %c0_9 = arith.constant 0 : index
    %c0_10 = arith.constant 0 : index
    %12 = vector.load %arg5[%c0_9, %c0_10] : memref<256x1xf32, #tpu.memory_space<vmem>>, vector<256x1xf32>
    %13 = vector.broadcast %12 : vector<256x1xf32> to vector<256x128xf32>
    %14 = arith.addf %11, %13 : vector<256x128xf32>
    %cst_11 = arith.constant 0.000000e+00 : f32
    %15 = vector.broadcast %cst_11 : f32 to vector<256x128xf32>
    %16 = arith.maximumf %14, %15 : vector<256x128xf32>
    %c0_12 = arith.constant 0 : index
    %c0_13 = arith.constant 0 : index
    %17 = vector.load %arg6[%c0_12, %c0_13] : memref<128x256xbf16, #tpu.memory_space<vmem>>, vector<128x256xbf16>
    %18 = arith.truncf %16 : vector<256x128xf32> to vector<256x128xbf16>
    %cst_14 = arith.constant dense<0.000000e+00> : vector<128x128xf32>
    %19 = tpu.matmul %17, %18, %cst_14 {dimension_numbers = #tpu.dot_dimension_numbers<[1], [0], [0], [1], [0, 0, 1, 1], [], []>} : vector<128x256xbf16>, vector<256x128xbf16>, vector<128x128xf32> -> vector<128x128xf32>
    %c0_15 = arith.constant 0 : index
    %c0_16 = arith.constant 0 : index
    %20 = vector.load %arg7[%c0_15, %c0_16] : memref<128x1xf32, #tpu.memory_space<vmem>>, vector<128x1xf32>
    %21 = vector.broadcast %20 : vector<128x1xf32> to vector<128x128xf32>
    %22 = arith.addf %19, %21 : vector<128x128xf32>
    %cst_17 = arith.constant 0.000000e+00 : f32
    %23 = vector.broadcast %cst_17 : f32 to vector<128x128xf32>
    %24 = arith.maximumf %22, %23 : vector<128x128xf32>
    %c0_18 = arith.constant 0 : index
    %c0_19 = arith.constant 0 : index
    %25 = vector.load %arg8[%c0_18, %c0_19] : memref<128x1xf32, #tpu.memory_space<vmem>>, vector<128x1xf32>
    %26 = vector.broadcast %25 : vector<128x1xf32> to vector<128x128xf32>
    %27 = arith.mulf %24, %26 : vector<128x128xf32>
    %cst_20 = arith.constant dense<0.000000e+00> : vector<128xf32>
    %28 = vector.multi_reduction <add>, %27, %cst_20 [0] : vector<128x128xf32> to vector<128xf32>
    %29 = vector.shape_cast %28 : vector<128xf32> to vector<1x128xf32>
    %c0_21 = arith.constant 0 : index
    %c0_22 = arith.constant 0 : index
    %30 = memref.load %arg9[%c0_21, %c0_22] : memref<1x1xf32, #tpu.memory_space<smem>>
    %31 = vector.broadcast %30 : f32 to vector<1x128xf32>
    %32 = arith.addf %29, %31 : vector<1x128xf32>
    %33 = arith.negf %32 : vector<1x128xf32>
    %34 = math.exp %33 : vector<1x128xf32>
    %cst_23 = arith.constant 1.000000e+00 : f32
    %35 = vector.broadcast %cst_23 : f32 to vector<1x128xf32>
    %36 = arith.addf %35, %34 : vector<1x128xf32>
    %37 = arith.divf %35, %36 : vector<1x128xf32>
    %c0_24 = arith.constant 0 : index
    %c0_25 = arith.constant 0 : index
    %38 = vector.load %arg10[%c0_24, %c0_25] : memref<1x128xf32, #tpu.memory_space<vmem>>, vector<1x128xf32>
    tpu.vector_store %arg10[%c0_24, %c0_25], %37 {strides = array<i32>} : memref<1x128xf32, #tpu.memory_space<vmem>>, vector<1x128xf32>,
    return
  }
  func.func @transform_0(%arg0: i32) -> (i32, i32) {
    %c0_i32 = arith.constant 0 : i32
    %c0_i32_0 = arith.constant 0 : i32
    return %arg0, %c0_i32 : i32, i32
  }
  func.func @transform_1(%arg0: i32) -> (i32, i32) {
    %c0_i32 = arith.constant 0 : i32
    %c0_i32_0 = arith.constant 0 : i32
    %c0_i32_1 = arith.constant 0 : i32
    return %c0_i32, %c0_i32_0 : i32, i32
  }
  func.func @transform_2(%arg0: i32) -> (i32, i32) {
    %c0_i32 = arith.constant 0 : i32
    %c0_i32_0 = arith.constant 0 : i32
    %c0_i32_1 = arith.constant 0 : i32
    return %c0_i32, %c0_i32_0 : i32, i32
  }
  func.func @transform_3(%arg0: i32) -> (i32, i32) {
    %c0_i32 = arith.constant 0 : i32
    %c0_i32_0 = arith.constant 0 : i32
    %c0_i32_1 = arith.constant 0 : i32
    return %c0_i32, %c0_i32_0 : i32, i32
  }
  func.func @transform_4(%arg0: i32) -> (i32, i32) {
    %c0_i32 = arith.constant 0 : i32
    %c0_i32_0 = arith.constant 0 : i32
    %c0_i32_1 = arith.constant 0 : i32
    return %c0_i32, %c0_i32_0 : i32, i32
  }
  func.func @transform_5(%arg0: i32) -> (i32, i32) {
    %c0_i32 = arith.constant 0 : i32
    %c0_i32_0 = arith.constant 0 : i32
    %c0_i32_1 = arith.constant 0 : i32
    return %c0_i32, %c0_i32_0 : i32, i32
  }
  func.func @transform_6(%arg0: i32) -> (i32, i32) {
    %c0_i32 = arith.constant 0 : i32
    %c0_i32_0 = arith.constant 0 : i32
    %c0_i32_1 = arith.constant 0 : i32
    return %c0_i32, %c0_i32_0 : i32, i32
  }
  func.func @transform_7(%arg0: i32) -> (i32, i32) {
    %c0_i32 = arith.constant 0 : i32
    %c0_i32_0 = arith.constant 0 : i32
    %c0_i32_1 = arith.constant 0 : i32
    return %c0_i32, %c0_i32_0 : i32, i32
  }
  func.func @transform_8(%arg0: i32) -> (i32, i32) {
    %c0_i32 = arith.constant 0 : i32
    %c0_i32_0 = arith.constant 0 : i32
    %c0_i32_1 = arith.constant 0 : i32
    return %c0_i32, %c0_i32_0 : i32, i32
  }
  func.func @transform_9(%arg0: i32) -> (i32, i32) {
    %c0_i32 = arith.constant 0 : i32
    %c0_i32_0 = arith.constant 0 : i32
    return %c0_i32, %arg0 : i32, i32
  }
}

</mosaic_0001>

<bundles_post_ra>
// kernel: tpu_custom_call.1
= control target key start
LH: loop header
LB: loop body
LE: loop exit
PB: predicated region body
PF: predicated region fallthrough
CT: control target
= control target key end

     0   :  { %v1527_v3 = vmov 0   ;;  %vm210_vm0 = vcmask 80896   ;;  %s2167_s0 = inlined_call_operand.vmem [shape: f32[128,10], index: 0, kind: input, shape index: {}]   ;;  %s2168_s1 = inlined_call_operand.vmem [shape: bf16[128,10], index: 1, kind: input, shape index: {}]   ;;  %s2169_s2 = inlined_call_operand.vmem [shape: f32[128,1], index: 2, kind: input, shape index: {}]   ;;  %s2170_s3 = inlined_call_operand.vmem [shape: bf16[256,128], index: 3, kind: input, shape index: {}]   ;;  %s2171_s4 = inlined_call_operand.vmem [shape: f32[256,1], index: 4, kind: input, shape index: {}]   ;;  %s2172_s5 = inlined_call_operand.vmem [shape: bf16[128,256], index: 5, kind: input, shape index: {}]   ;;  %s2173_s6 = inlined_call_operand.vmem [shape: f32[128,1], index: 6, kind: input, shape index: {}]   ;;  %s2174_s7 = inlined_call_operand.vmem [shape: f32[128,1], index: 7, kind: input, shape index: {}]   ;;  %s2175_s8 = inlined_call_operand.<no memory space> [shape: f32[1,1], index: 8, kind: input, shape index: {}]   ;;  %s2176_s9 = inlined_call_operand.hbm [shape: f32[1,128], index: 9, kind: output, shape index: {}]  }
   0x1   :  { %v88_v0 = vld [vmem:[%s2169_s2 + $0x70] sm:$0xff]  ;;  %v86_v1 = vld [vmem:[%s2169_s2 + $0x60] sm:$0xff]  ;;  %1495 = vset.pattern.permute.xlu1 %v1527_v3  ;;  %1494 = vset.pattern.permute.xlu0 %v1527_v3  ;;  %v49_v4 = vld [vmem:[%s2167_s0 + $0x78] sm:$0xff] }
   0x2   :  { %v48_v2 = vld [vmem:[%s2167_s0 + $0x70] sm:$0xff]  ;;  %162 = vperm.xlu0 %1494, %v88_v0   ;;  %152 = vperm.xlu1 %1495, %v86_v1   ;;  %v46_v7 = vld [vmem:[%s2167_s0 + $0x60] sm:$0xff]  ;;  %v47_v8 = vld [vmem:[%s2167_s0 + $0x68] sm:$0xff] }
   0x3   :  { %v57_v5 = vpack.c.bf16 %v49_v4, %v48_v2  ;;  %v84_v6 = vld [vmem:[%s2169_s2 + $0x50] sm:$0xff]  ;;  %1496 = vset.pattern.permute.xlu2 %v1527_v3  ;;  %v56_v10 = vpack.c.bf16 %v47_v8, %v46_v7  ;;  %v89_v11 = vld [vmem:[%s2169_s2 + $0x78] sm:$0xff]  ;;  %v87_v12 = vld [vmem:[%s2169_s2 + $0x68] sm:$0xff] }
   0x4   :  { %142 = vperm.xlu2 %1496, %v84_v6  }
   0x5   :  { %v257_v9 = vsel %vm210_vm0, %v57_v5, 0 }
   0x6   :  { %259 = vmatpush.bf16.xpose.msra.mxu0 %v257_v9 }
   0x7   :  { %15 = vsyncpa [#allocation4], 0  ;;  %v85_v13 = vld [vmem:[%s2169_s2 + $0x58] sm:$0xff]  ;;  %v254_v14 = vsel %vm210_vm0, %v56_v10, 0  ;;  %v44_v15 = vld [vmem:[%s2167_s0 + $0x50] sm:$0xff]  ;;  %s1528_s20 = smov [#allocation3]  }
   0x8   :  { %v45_v16 = vld [vmem:[%s2167_s0 + $0x58] sm:$0xff]  ;;  %v83_v18 = vld [vmem:[%s2169_s2 + $0x48] sm:$0xff]  ;;  %v82_v19 = vld [vmem:[%s2169_s2 + $0x40] sm:$0xff]  ;;  %s1256_s21 = sshll.u32 %s1528_s20, 4  ;;  %s1257_s21 = int_to_ptr.vmem [resolvable:$true] %s1256_s21 }
   0x9   :  { %v55_v17 = vpack.c.bf16 %v45_v16, %v44_v15  ;;  %v80_v20 = vld [vmem:[%s2169_s2 + $0x30] sm:$0xff]  ;;  %v42_v22 = vld [vmem:[%s2167_s0 + $0x40] sm:$0xff]  ;;  %v43_v23 = vld [vmem:[%s2167_s0 + $0x48] sm:$0xff] }
   0xa   :  { %167 = vperm.xlu0 %1494, %v89_v11   ;;  %157 = vperm.xlu1 %1495, %v87_v12   ;;  %v54_v24 = vpack.c.bf16 %v43_v23, %v42_v22  ;;  %v81_v25 = vld [vmem:[%s2169_s2 + $0x38] sm:$0xff]  ;;  %v78_v26 = vld [vmem:[%s2169_s2 + $0x20] sm:$0xff]  ;;  %v79_v27 = vld [vmem:[%s2169_s2 + $0x28] sm:$0xff] }
   0xb   :  { %v251_v21 = vsel %vm210_vm0, %v55_v17, 0  ;;  %v40_v29 = vld [vmem:[%s2167_s0 + $0x30] sm:$0xff]  ;;  %v41_v30 = vld [vmem:[%s2167_s0 + $0x38] sm:$0xff]  ;;  %v74_v34 = vld [vmem:[%s2169_s2] sm:$0xff] }
   0xc   :  { %147 = vperm.xlu2 %1496, %v85_v13   ;;  %v248_v28 = vsel %vm210_vm0, %v54_v24, 0  ;;  %v53_v31 = vpack.c.bf16 %v41_v30, %v40_v29  ;;  %v77_v32 = vld [vmem:[%s2169_s2 + $0x18] sm:$0xff]  ;;  %v76_v33 = vld [vmem:[%s2169_s2 + $0x10] sm:$0xff]  ;;  %v38_v36 = vld [vmem:[%s2167_s0 + $0x20] sm:$0xff] }
   0xd   :  { %v39_v37 = vld [vmem:[%s2167_s0 + $0x28] sm:$0xff]  ;;  %v364_v39 = vld [vmem:[%s2171_s4] sm:$0xff]  ;;  %v378_v41 = vld [vmem:[%s2171_s4 + $0x70] sm:$0xff] }
   0xe   :  { %260 = vmatpush.bf16.xpose.msra.mxu0 %v254_v14  ;;  %v245_v35 = vsel %vm210_vm0, %v53_v31, 0  ;;  %v52_v38 = vpack.c.bf16 %v39_v37, %v38_v36  ;;  %v75_v40 = vld [vmem:[%s2169_s2 + $0x8] sm:$0xff]  ;;  %v36_v43 = vld [vmem:[%s2167_s0 + $0x10] sm:$0xff]  ;;  %v37_v44 = vld [vmem:[%s2167_s0 + $0x18] sm:$0xff] }
   0xf   :  { %v51_v45 = vpack.c.bf16 %v37_v44, %v36_v43  ;;  %v394_v46 = vld [vmem:[%s2171_s4 + $0xf0] sm:$0xff]  ;;  %v379_v47 = vld [vmem:[%s2171_s4 + $0x78] sm:$0xff]  ;;  %v34_v50 = vld [vmem:[%s2167_s0] sm:$0xff] }
  0x10   :  { %v242_v42 = vsel %vm210_vm0, %v52_v38, 0  ;;  %v395_v48 = vld [vmem:[%s2171_s4 + $0xf8] sm:$0xff]  ;;  %v35_v51 = vld [vmem:[%s2167_s0 + $0x8] sm:$0xff]  ;;  %v376_v54 = vld [vmem:[%s2171_s4 + $0x60] sm:$0xff] }
  0x11   :  { %v239_v49 = vsel %vm210_vm0, %v51_v45, 0  ;;  %v50_v52 = vpack.c.bf16 %v35_v51, %v34_v50  ;;  %v377_v53 = vld [vmem:[%s2171_s4 + $0x68] sm:$0xff]  ;;  %v392_v55 = vld [vmem:[%s2171_s4 + $0xe0] sm:$0xff]  ;;  %v374_v57 = vld [vmem:[%s2171_s4 + $0x50] sm:$0xff] }
  0x12   :  { %137 = vperm.xlu1 %1495, %v83_v18   ;;  %132 = vperm.xlu0 %1494, %v82_v19   ;;  %v393_v58 = vld [vmem:[%s2171_s4 + $0xe8] sm:$0xff]  ;;  %v1436_v59 = vld [vmem:[%s2168_s1] sm:$0xff]  ;;  %v375_v60 = vld [vmem:[%s2171_s4 + $0x58] sm:$0xff] }
  0x13   :  { %v236_v56 = vsel %vm210_vm0, %v50_v52, 0  ;;  %v391_v61 = vld [vmem:[%s2171_s4 + $0xd8] sm:$0xff]  ;;  %v390_v62 = vld [vmem:[%s2171_s4 + $0xd0] sm:$0xff]  ;;  %v372_v63 = vld [vmem:[%s2171_s4 + $0x40] sm:$0xff] }
  0x14   :  { %122 = vperm.xlu2 %1496, %v80_v20   ;;  %v388_v0 = vld [vmem:[%s2171_s4 + $0xc0] sm:$0xff]  ;;  %v373_v1 = vld [vmem:[%s2171_s4 + $0x48] sm:$0xff]  ;;  %v371_v4 = vld [vmem:[%s2171_s4 + $0x38] sm:$0xff] }
  0x15   :  { %v1437_v2 = vld [vmem:[%s2168_s1 + $0x8] sm:$0xff]  ;;  %v370_v5 = vld [vmem:[%s2171_s4 + $0x30] sm:$0xff]  ;;  %v368_v7 = vld [vmem:[%s2171_s4 + $0x20] sm:$0xff] }
  0x16   :  { %261 = vmatpush.bf16.xpose.msra.mxu0 %v251_v21  ;;  %v389_v3 = vld [vmem:[%s2171_s4 + $0xc8] sm:$0xff]  ;;  %v386_v6 = vld [vmem:[%s2171_s4 + $0xb0] sm:$0xff]  ;;  %v387_v8 = vld [vmem:[%s2171_s4 + $0xb8] sm:$0xff] }
  0x17   :  { %v1438_v9 = vld [vmem:[%s2168_s1 + $0x10] sm:$0xff]  ;;  %v369_v10 = vld [vmem:[%s2171_s4 + $0x28] sm:$0xff]  ;;  %v384_v12 = vld [vmem:[%s2171_s4 + $0xa0] sm:$0xff] }
  0x18   :  { %v385_v11 = vld [vmem:[%s2171_s4 + $0xa8] sm:$0xff]  ;;  %v366_v13 = vld [vmem:[%s2171_s4 + $0x10] sm:$0xff]  ;;  %v367_v15 = vld [vmem:[%s2171_s4 + $0x18] sm:$0xff] }
  0x19   :  { %v382_v14 = vld [vmem:[%s2171_s4 + $0x90] sm:$0xff]  ;;  %v1439_v16 = vld [vmem:[%s2168_s1 + $0x18] sm:$0xff]  ;;  %v380_v18 = vld [vmem:[%s2171_s4 + $0x80] sm:$0xff] }
  0x1a   :  { %127 = vperm.xlu0 %1494, %v81_v25   ;;  %112 = vperm.xlu1 %1495, %v78_v26   ;;  %v383_v17 = vld [vmem:[%s2171_s4 + $0x98] sm:$0xff]  ;;  %v365_v19 = vld [vmem:[%s2171_s4 + $0x8] sm:$0xff]  ;;  %v805_v22 = vld [vmem:[%s2173_s6] sm:$0xff] }
  0x1b   :  { %v381_v20 = vld [vmem:[%s2171_s4 + $0x88] sm:$0xff]  ;;  %v1440_v23 = vld [vmem:[%s2168_s1 + $0x20] sm:$0xff]  ;;  %v807_v24 = vld [vmem:[%s2173_s6 + $0x10] sm:$0xff] }
  0x1c   :  { %117 = vperm.xlu2 %1496, %v79_v27   ;;  %v806_v21 = vld [vmem:[%s2173_s6 + $0x8] sm:$0xff]  ;;  %v809_v25 = vld [vmem:[%s2173_s6 + $0x20] sm:$0xff]  ;;  %v808_v26 = vld [vmem:[%s2173_s6 + $0x18] sm:$0xff] }
  0x1d   :  { %v810_v27 = vld [vmem:[%s2173_s6 + $0x28] sm:$0xff]  ;;  %v811_v29 = vld [vmem:[%s2173_s6 + $0x30] sm:$0xff]  ;;  %v813_v31 = vld [vmem:[%s2173_s6 + $0x40] sm:$0xff] }
  0x1e   :  { %262 = vmatpush.bf16.xpose.msra.mxu0 %v248_v28  ;;  %v812_v28 = vld [vmem:[%s2173_s6 + $0x38] sm:$0xff]  ;;  %v1441_v30 = vld [vmem:[%s2168_s1 + $0x28] sm:$0xff]  ;;  %v1095_v37 = vld [vmem:[%s2174_s7] sm:$0xff] }
  0x1f   :  { %v817_v38 = vld [vmem:[%s2173_s6 + $0x60] sm:$0xff]  ;;  %v1097_v43 = vld [vmem:[%s2174_s7 + $0x10] sm:$0xff]  ;;  %v1102_v51 = vld [vmem:[%s2174_s7 + $0x38] sm:$0xff] }
  0x20   :  { %v1099_v45 = vld [vmem:[%s2174_s7 + $0x20] sm:$0xff] }
  0x22   :  { %107 = vperm.xlu1 %1495, %v77_v32   ;;  %102 = vperm.xlu0 %1494, %v76_v33   ;;  %v815_v33 = vld [vmem:[%s2173_s6 + $0x50] sm:$0xff] }
  0x24   :  { %92 = vperm.xlu2 %1496, %v74_v34   ;;  %v814_v34 = vld [vmem:[%s2173_s6 + $0x48] sm:$0xff] }
  0x26   :  { %263 = vmatpush.bf16.xpose.msra.mxu0 %v245_v35  ;;  %v816_v35 = vld [vmem:[%s2173_s6 + $0x58] sm:$0xff] }
  0x2a   :  { %398 = vperm.xlu1 %1495, %v364_v39   ;;  %97 = vperm.xlu0 %1494, %v75_v40   ;;  %v1442_v39 = vld [vmem:[%s2168_s1 + $0x30] sm:$0xff] }
  0x2c   :  { %468 = vperm.xlu2 %1496, %v378_v41   ;;  %v1096_v41 = vld [vmem:[%s2174_s7 + $0x8] sm:$0xff] }
  0x2e   :  { %264 = vmatpush.bf16.xpose.msra.mxu0 %v242_v42  ;;  %v1098_v42 = vld [vmem:[%s2174_s7 + $0x18] sm:$0xff] }
  0x32   :  { %548 = vperm.xlu1 %1495, %v394_v46   ;;  %473 = vperm.xlu0 %1494, %v379_v47   ;;  %v1101_v47 = vld [vmem:[%s2174_s7 + $0x30] sm:$0xff] }
  0x34   :  { %553 = vperm.xlu2 %1496, %v395_v48   ;;  %v1100_v48 = vld [vmem:[%s2174_s7 + $0x28] sm:$0xff] }
  0x36   :  { %265 = vmatpush.bf16.xpose.msra.mxu0 %v239_v49  ;;  %v1443_v49 = vld [vmem:[%s2168_s1 + $0x38] sm:$0xff] }
  0x3a   :  { %463 = vperm.xlu1 %1495, %v377_v53   ;;  %458 = vperm.xlu0 %1494, %v376_v54   ;;  %v1104_v54 = vld [vmem:[%s2174_s7 + $0x48] sm:$0xff] }
  0x3c   :  { %538 = vperm.xlu2 %1496, %v392_v55   ;;  %v1103_v55 = vld [vmem:[%s2174_s7 + $0x40] sm:$0xff] }
  0x3e   :  { %266 = vmatpush.bf16.xpose.msra.mxu0 %v236_v56  ;;  %v818_v56 = vld [vmem:[%s2173_s6 + $0x68] sm:$0xff] }
  0x42   :  { %448 = vperm.xlu1 %1495, %v374_v57   ;;  %543 = vperm.xlu0 %1494, %v393_v58  }
  0x44   :  { %453 = vperm.xlu2 %1496, %v375_v60   ;;  %v819_v60 = vld [vmem:[%s2173_s6 + $0x70] sm:$0xff] }
  0x45   :  { %1299 = vmatmul.msk.bf16.vlgmr.msra.gmra.mxu0 %vm210_vm0, %v1436_v59 }
  0x4a   :  { %533 = vperm.xlu1 %1495, %v391_v61   ;;  %528 = vperm.xlu0 %1494, %v390_v62   ;;  %v1105_v61 = vld [vmem:[%s2174_s7 + $0x50] sm:$0xff] }
  0x4c   :  { %438 = vperm.xlu2 %1496, %v372_v63   ;;  %v1106_v63 = vld [vmem:[%s2174_s7 + $0x58] sm:$0xff] }
  0x52   :  { %518 = vperm.xlu1 %1495, %v388_v0   ;;  %443 = vperm.xlu0 %1494, %v373_v1  }
  0x54   :  { %523 = vperm.xlu2 %1496, %v389_v3   ;;  %v820_v3 = vld [vmem:[%s2173_s6 + $0x78] sm:$0xff] }
  0x55   :  { %1300 = vmatmul.msk.bf16.gmra.mxu0 %vm210_vm0, %v1437_v2  ;;  %v1107_v2 = vld [vmem:[%s2174_s7 + $0x60] sm:$0xff] }
  0x5a   :  { %433 = vperm.xlu1 %1495, %v371_v4   ;;  %428 = vperm.xlu0 %1494, %v370_v5  }
  0x5c   :  { %508 = vperm.xlu2 %1496, %v386_v6  }
  0x5e   :  { %v1841_v36 = vpop.permute.xlu2 %142 }
  0x62   :  { %418 = vperm.xlu1 %1495, %v368_v7   ;;  %513 = vperm.xlu0 %1494, %v387_v8   ;;  %v1108_v7 = vld [vmem:[%s2174_s7 + $0x68] sm:$0xff] }
  0x64   :  { %423 = vperm.xlu2 %1496, %v369_v10  }
  0x65   :  { %1301 = vmatmul.msk.bf16.gmra.mxu0 %vm210_vm0, %v1438_v9 }
  0x66   :  { %v1864_v44 = vpop.permute.xlu2 %147 }
  0x6a   :  { %503 = vperm.xlu1 %1495, %v385_v11   ;;  %498 = vperm.xlu0 %1494, %v384_v12  }
  0x6c   :  { %408 = vperm.xlu2 %1496, %v366_v13   ;;  %v1110_v13 = vld [vmem:[%s2174_s7 + $0x78] sm:$0xff] }
  0x6e   :  { %v123_v52 = vpop.permute.xlu2 %122 }
  0x72   :  { %488 = vperm.xlu1 %1495, %v382_v14   ;;  %413 = vperm.xlu0 %1494, %v367_v15   ;;  %v1109_v14 = vld [vmem:[%s2174_s7 + $0x70] sm:$0xff] }
  0x74   :  { %493 = vperm.xlu2 %1496, %v383_v17   ;;  %v1830_v32 = vpop.permute.xlu0 %162  ;;  %v1880_v50 = vpop.permute.xlu1 %152 }
  0x75   :  { %1302 = vmatmul.msk.bf16.gmra.mxu0 %vm210_vm0, %v1439_v16 }
  0x76   :  { %v118_v58 = vpop.permute.xlu2 %117 }
  0x7a   :  { %478 = vperm.xlu1 %1495, %v380_v18   ;;  %403 = vperm.xlu0 %1494, %v365_v19  }
  0x7c   :  { %483 = vperm.xlu2 %1496, %v381_v20   ;;  %v1852_v40 = vpop.permute.xlu0 %167  ;;  %v158_v57 = vpop.permute.xlu1 %157 }
  0x7e   :  { %v93_v1 = vpop.permute.xlu2 %92 }
  0x82   :  { %828 = vperm.xlu1 %1495, %v806_v21   ;;  %823 = vperm.xlu0 %1494, %v805_v22  }
  0x84   :  { %833 = vperm.xlu2 %1496, %v807_v24   ;;  %v1869_v46 = vpop.permute.xlu0 %132  ;;  %v1904_v0 = vpop.permute.xlu1 %137 }
  0x85   :  { %1303 = vmatmul.msk.bf16.gmra.mxu0 %vm210_vm0, %v1440_v23 }
  0x8a   :  { %843 = vperm.xlu1 %1495, %v809_v25   ;;  %838 = vperm.xlu0 %1494, %v808_v26  }
  0x8c   :  { %848 = vperm.xlu2 %1496, %v810_v27   ;;  %v128_v53 = vpop.permute.xlu0 %127  ;;  %v113_v12 = vpop.permute.xlu1 %112 }
  0x92   :  { %858 = vperm.xlu1 %1495, %v812_v28   ;;  %853 = vperm.xlu0 %1494, %v811_v29  }
  0x94   :  { %863 = vperm.xlu2 %1496, %v813_v31   ;;  %v103_v59 = vpop.permute.xlu0 %102  ;;  %v108_v17 = vpop.permute.xlu1 %107 }
  0x95   :  { %1304 = vmatmul.msk.bf16.gmra.mxu0 %vm210_vm0, %v1441_v30 }
  0x9a   :  { %873 = vperm.xlu1 %1495, %v815_v33   ;;  %868 = vperm.xlu0 %1494, %v814_v34  }
  0x9c   :  { %878 = vperm.xlu2 %1496, %v816_v35   ;;  %v98_v5 = vpop.permute.xlu0 %97 }
  0xa2   :  { %1113 = vperm.xlu1 %1495, %v1095_v37   ;;  %883 = vperm.xlu0 %1494, %v817_v38  }
  0xa4   :  { %1118 = vperm.xlu2 %1496, %v1096_v41  }
  0xa5   :  { %1305 = vmatmul.msk.bf16.gmra.mxu0 %vm210_vm0, %v1442_v39 }
  0xaa   :  { %1128 = vperm.xlu1 %1495, %v1098_v42   ;;  %1123 = vperm.xlu0 %1494, %v1097_v43  }
  0xac   :  { %1133 = vperm.xlu2 %1496, %v1099_v45  }
  0xb2   :  { %1143 = vperm.xlu1 %1495, %v1101_v47   ;;  %1138 = vperm.xlu0 %1494, %v1100_v48  }
  0xb4   :  { %1148 = vperm.xlu2 %1496, %v1102_v51  }
  0xb5   :  { %1306 = vmatmul.msk.bf16.gmra.mxu0 %vm210_vm0, %v1443_v49 }
  0xba   :  { %1158 = vperm.xlu1 %1495, %v1104_v54   ;;  %1153 = vperm.xlu0 %1494, %v1103_v55  }
  0xbc   :  { %888 = vperm.xlu2 %1496, %v818_v56  }
  0xc2   :  { %v268_v62 = vpop.f32.mrf.mxu0  ;;  %893 = vperm.xlu1 %1495, %v819_v60   ;;  %1163 = vperm.xlu0 %1494, %v1105_v61  }
  0xc3   :  { %v269_v4 = vadd.f32 %v268_v62, %v93_v1 }
  0xc4   :  { %1168 = vperm.xlu2 %1496, %v1106_v63  }
  0xc5   :  { %v308_v9 = vmax.f32 %v269_v4, 0.0  ;;  %v1445_v4 = vld [vmem:[%s2170_s3 + $0x8] sm:$0xff] }
  0xca   :  { %v270_v6 = vpop.f32.mrf.mxu0  ;;  %1173 = vperm.xlu1 %1495, %v1107_v2   ;;  %898 = vperm.xlu0 %1494, %v820_v3   ;;  %v1457_v3 = vld [vmem:[%s2170_s3 + $0x68] sm:$0xff] }
  0xcb   :  { %v271_v8 = vadd.f32 %v270_v6, %v98_v5  ;;  %v1456_v5 = vld [vmem:[%s2170_s3 + $0x60] sm:$0xff]  ;;  %v1458_v6 = vld [vmem:[%s2170_s3 + $0x70] sm:$0xff] }
  0xcc   :  { %1178 = vperm.xlu2 %1496, %v1108_v7   ;;  %v1446_v7 = vld [vmem:[%s2170_s3 + $0x10] sm:$0xff] }
  0xcd   :  { %v309_v10 = vmax.f32 %v271_v8, 0.0  ;;  %v1459_v8 = vld [vmem:[%s2170_s3 + $0x78] sm:$0xff] }
  0xcf   :  { %v1915_v11 = vpack.c.bf16 %v309_v10, %v308_v9  ;;  %v1957_v9 = vpop.permute.xlu0 %473  ;;  %v1447_v10 = vld [vmem:[%s2170_s3 + $0x18] sm:$0xff] }
  0xd2   :  { %v273_v15 = vpop.f32.mrf.mxu0  ;;  %1188 = vperm.xlu1 %1495, %v1110_v13   ;;  %1183 = vperm.xlu0 %1494, %v1109_v14   ;;  %v1969_v14 = vpop.permute.xlu2 %468 }
  0xd3   :  { %v274_v16 = vadd.f32 %v273_v15, %v103_v59 }
  0xd5   :  { %v310_v20 = vmax.f32 %v274_v16, 0.0  ;;  %v1449_v16 = vld [vmem:[%s2170_s3 + $0x28] sm:$0xff] }
  0xda   :  { %v275_v18 = vpop.f32.mrf.mxu0 }
  0xdb   :  { %v276_v19 = vadd.f32 %v275_v18, %v108_v17  ;;  %v1976_v17 = vpop.permute.xlu2 %553 }
  0xdd   :  { %v311_v21 = vmax.f32 %v276_v19, 0.0 }
  0xdf   :  { %v357_v22 = vpack.c.bf16 %v311_v21, %v310_v20  ;;  %v399_v20 = vpop.permute.xlu1 %398  ;;  %v1450_v21 = vld [vmem:[%s2170_s3 + $0x30] sm:$0xff] }
  0xe2   :  { %v278_v23 = vpop.f32.mrf.mxu0 }
  0xe3   :  { %v279_v24 = vadd.f32 %v278_v23, %v113_v12  ;;  %v1448_v12 = vld [vmem:[%s2170_s3 + $0x20] sm:$0xff]  ;;  %v1980_v19 = vpop.permute.xlu2 %538 }
  0xe5   :  { %v312_v27 = vmax.f32 %v279_v24, 0.0 }
  0xe7   :  { %v549_v24 = vpop.permute.xlu1 %548 }
  0xea   :  { %v280_v25 = vpop.f32.mrf.mxu0 }
  0xeb   :  { %v281_v26 = vadd.f32 %v280_v25, %v118_v58  ;;  %v1987_v23 = vpop.permute.xlu2 %453 }
  0xed   :  { %v313_v28 = vmax.f32 %v281_v26, 0.0 }
  0xef   :  { %v358_v29 = vpack.c.bf16 %v313_v28, %v312_v27  ;;  %v1451_v27 = vld [vmem:[%s2170_s3 + $0x38] sm:$0xff]  ;;  %v1996_v28 = vpop.permute.xlu1 %463 }
  0xf2   :  { %v283_v30 = vpop.f32.mrf.mxu0 }
  0xf3   :  { %v284_v31 = vadd.f32 %v283_v30, %v123_v52  ;;  %v1991_v26 = vpop.permute.xlu2 %438 }
  0xf5   :  { %v314_v35 = vmax.f32 %v284_v31, 0.0 }
  0xf7   :  { %v2002_v31 = vpop.permute.xlu1 %448 }
  0xfa   :  { %v285_v33 = vpop.f32.mrf.mxu0 }
  0xfb   :  { %v286_v34 = vadd.f32 %v285_v33, %v128_v53  ;;  %v2000_v30 = vpop.permute.xlu2 %523 }
  0xfd   :  { %v315_v37 = vmax.f32 %v286_v34, 0.0  ;;  %v1452_v34 = vld [vmem:[%s2170_s3 + $0x40] sm:$0xff] }
  0xff   :  { %v359_v38 = vpack.c.bf16 %v315_v37, %v314_v35 }
 0x102   :  { %v288_v39 = vpop.f32.mrf.mxu0 }
 0x103   :  { %v2007_v37 = vpop.permute.xlu2 %508 }
 0x10a   :  { %v290_v41 = vpop.f32.mrf.mxu0 }
 0x112   :  { %v293_v42 = vpop.f32.mrf.mxu0 }
 0x113   :  { %v294_v61 = vadd.f32 %v293_v42, %v1841_v36 }
 0x115   :  { %v318_v1 = vmax.f32 %v294_v61, 0.0 }
 0x11a   :  { %v295_v43 = vpop.f32.mrf.mxu0 }
 0x11b   :  { %v296_v58 = vadd.f32 %v295_v43, %v1864_v44 }
 0x11d   :  { %v319_v63 = vmax.f32 %v296_v58, 0.0 }
 0x11f   :  { %v361_v44 = vpack.c.bf16 %v319_v63, %v318_v1 }
 0x122   :  { %v298_v45 = vpop.f32.mrf.mxu0 }
 0x123   :  { %v299_v52 = vadd.f32 %v298_v45, %v1880_v50 }
 0x125   :  { %v320_v62 = vmax.f32 %v299_v52, 0.0 }
 0x12a   :  { %v300_v47 = vpop.f32.mrf.mxu0 }
 0x12b   :  { %v301_v54 = vadd.f32 %v300_v47, %v158_v57 }
 0x12d   :  { %v321_v59 = vmax.f32 %v301_v54, 0.0 }
 0x12f   :  { %v362_v57 = vpack.c.bf16 %v321_v59, %v320_v62 }
 0x132   :  { %v303_v48 = vpop.f32.mrf.mxu0 }
 0x133   :  { %v304_v49 = vadd.f32 %v303_v48, %v1830_v32  ;;  %v291_v32 = vadd.f32 %v290_v41, %v1904_v0  ;;  %v1455_v0 = vld [vmem:[%s2170_s3 + $0x58] sm:$0xff] }
 0x135   :  { %v322_v56 = vmax.f32 %v304_v49, 0.0  ;;  %v317_v50 = vmax.f32 %v291_v32, 0.0  ;;  %v424_v49 = vpop.permute.xlu2 %423 }
 0x13a   :  { %v305_v51 = vpop.f32.mrf.mxu0 }
 0x13b   :  { %v306_v55 = vadd.f32 %v305_v51, %v1852_v40  ;;  %v289_v40 = vadd.f32 %v288_v39, %v1869_v46  ;;  %v1444_v46 = vld [vmem:[%s2170_s3] sm:$0xff] }
 0x13d   :  { %v323_v53 = vmax.f32 %v306_v55, 0.0  ;;  %v316_v2 = vmax.f32 %v289_v40, 0.0  ;;  %v1453_v55 = vld [vmem:[%s2170_s3 + $0x48] sm:$0xff] }
 0x13f   :  { %v363_v60 = vpack.c.bf16 %v323_v53, %v322_v56  ;;  %v360_v36 = vpack.c.bf16 %v317_v50, %v316_v2  ;;  %v409_v53 = vpop.permute.xlu2 %408  ;;  %v1454_v50 = vld [vmem:[%s2170_s3 + $0x50] sm:$0xff] }
 0x141   :  { %652 = vmatpush.bf16.msra.mxu1 %v363_v60  ;;  %1476 = vmatpush.bf16.msra.mxu2 %v363_v60 }
 0x142   :  { %1477 = vmatpush.bf16.msra.mxu3 %v363_v60 }
 0x145   :  { %653 = vmatpush.bf16.msra.mxu1 %v362_v57  ;;  %1478 = vmatpush.bf16.msra.mxu2 %v362_v57 }
 0x146   :  { %1479 = vmatpush.bf16.msra.mxu3 %v362_v57 }
 0x149   :  { %654 = vmatpush.bf16.msra.mxu1 %v361_v44  ;;  %1480 = vmatpush.bf16.msra.mxu2 %v361_v44 }
 0x14a   :  { %1481 = vmatpush.bf16.msra.mxu3 %v361_v44 }
 0x14d   :  { %655 = vmatpush.bf16.msra.mxu1 %v360_v36  ;;  %1482 = vmatpush.bf16.msra.mxu2 %v360_v36 }
 0x14e   :  { %1483 = vmatpush.bf16.msra.mxu3 %v360_v36 }
 0x151   :  { %656 = vmatpush.bf16.msra.mxu1 %v359_v38  ;;  %1484 = vmatpush.bf16.msra.mxu2 %v359_v38 }
 0x152   :  { %1485 = vmatpush.bf16.msra.mxu3 %v359_v38  ;;  %v534_v38 = vpop.permute.xlu1 %533 }
 0x155   :  { %657 = vmatpush.bf16.msra.mxu1 %v358_v29  ;;  %1486 = vmatpush.bf16.msra.mxu2 %v358_v29 }
 0x156   :  { %1487 = vmatpush.bf16.msra.mxu3 %v358_v29 }
 0x159   :  { %658 = vmatpush.bf16.msra.mxu1 %v357_v22  ;;  %1488 = vmatpush.bf16.msra.mxu2 %v357_v22 }
 0x15a   :  { %1489 = vmatpush.bf16.msra.mxu3 %v357_v22  ;;  %v519_v56 = vpop.permute.xlu1 %518 }
 0x15d   :  { %659 = vmatpush.bf16.msra.mxu1 %v1915_v11  ;;  %1490 = vmatpush.bf16.msra.mxu2 %v1915_v11 }
 0x15e   :  { %1491 = vmatpush.bf16.msra.mxu3 %v1915_v11  ;;  %v1962_v11 = vpop.permute.xlu0 %458 }
 0x160   :  { %660 = vmatmul.bf16.vlgmr.msra.gmra.mxu1 %v1444_v46  ;;  %715 = vmatmul.bf16.vlgmr.msra.gmra.mxu2 %v1455_v0 }
 0x161   :  { %725 = vmatmul.bf16.vlgmr.msra.gmra.mxu3 %v1457_v3 }
 0x162   :  { %v434_v57 = vpop.permute.xlu1 %433 }
 0x166   :  { %v1967_v13 = vpop.permute.xlu0 %543 }
 0x16a   :  { %v419_v36 = vpop.permute.xlu1 %418 }
 0x16e   :  { %v1971_v15 = vpop.permute.xlu0 %528 }
 0x170   :  { %665 = vmatmul.bf16.gmra.mxu1 %v1445_v4  ;;  %720 = vmatmul.bf16.gmra.mxu2 %v1456_v5 }
 0x171   :  { %730 = vmatmul.bf16.gmra.mxu3 %v1458_v6 }
 0x176   :  { %v1978_v18 = vpop.permute.xlu0 %443 }
 0x17e   :  { %v1985_v22 = vpop.permute.xlu0 %428 }
 0x180   :  { %670 = vmatmul.bf16.gmra.mxu1 %v1446_v7 }
 0x181   :  { %735 = vmatmul.bf16.gmra.mxu3 %v1459_v8 }
 0x186   :  { %v1989_v25 = vpop.permute.xlu0 %513 }
 0x18e   :  { %v1998_v29 = vpop.permute.xlu0 %498 }
 0x190   :  { %675 = vmatmul.bf16.gmra.mxu1 %v1447_v10 }
 0x196   :  { %v414_v33 = vpop.permute.xlu0 %413 }
 0x19e   :  { %v404_v42 = vpop.permute.xlu0 %403 }
 0x1a0   :  { %680 = vmatmul.bf16.gmra.mxu1 %v1448_v12 }
 0x1b0   :  { %685 = vmatmul.bf16.gmra.mxu1 %v1449_v16 }
 0x1c0   :  { %690 = vmatmul.bf16.gmra.mxu1 %v1450_v21 }
 0x1d0   :  { %695 = vmatmul.bf16.gmra.mxu1 %v1451_v27 }
 0x1dd   :  { %v661_v35 = vpop.f32.mrf.mxu1 }
 0x1de   :  { %v662_v39 = vadd.f32 %v661_v35, %v399_v20 }
 0x1e0   :  { %700 = vmatmul.bf16.gmra.mxu1 %v1452_v34  ;;  %v741_v47 = vmax.f32 %v662_v39, 0.0 }
 0x1e3   :  { %v716_v58 = vpop.f32.mrf.mxu2 }
 0x1e4   :  { %v726_v41 = vpop.f32.mrf.mxu3 }
 0x1e5   :  { %v663_v43 = vpop.f32.mrf.mxu1 }
 0x1e6   :  { %v664_v45 = vadd.f32 %v663_v43, %v404_v42 }
 0x1e8   :  { %v742_v48 = vmax.f32 %v664_v45, 0.0  ;;  %v727_v45 = vadd.f32 %v726_v41, %v1971_v15  ;;  %v717_v41 = vadd.f32 %v716_v58, %v2007_v37 }
 0x1ea   :  { %v2009_v51 = vpack.c.bf16 %v742_v48, %v741_v47 }
 0x1eb   :  { %v718_v2 = vpop.f32.mrf.mxu2 }
 0x1ec   :  { %v728_v54 = vpop.f32.mrf.mxu3 }
 0x1ed   :  { %v666_v52 = vpop.f32.mrf.mxu1  ;;  %v729_v35 = vadd.f32 %v728_v54, %v534_v38  ;;  %v719_v54 = vadd.f32 %v718_v2, %v1989_v25 }
 0x1ee   :  { %v667_v59 = vadd.f32 %v666_v52, %v409_v53  ;;  %v767_v52 = vmax.f32 %v727_v45, 0.0 }
 0x1ef   :  { %v768_v48 = vmax.f32 %v729_v35, 0.0  ;;  %v504_v35 = vpop.permute.xlu1 %503 }
 0x1f0   :  { %705 = vmatmul.bf16.gmra.mxu1 %v1453_v55  ;;  %v743_v32 = vmax.f32 %v667_v59, 0.0 }
 0x1f3   :  { %v721_v5 = vpop.f32.mrf.mxu2 }
 0x1f4   :  { %v731_v60 = vpop.f32.mrf.mxu3 }
 0x1f5   :  { %v668_v61 = vpop.f32.mrf.mxu1  ;;  %v732_v27 = vadd.f32 %v731_v60, %v1980_v19  ;;  %v722_v19 = vadd.f32 %v721_v5, %v519_v56  ;;  %v802_v60 = vpack.c.bf16 %v768_v48, %v767_v52 }
 0x1f6   :  { %v669_v62 = vadd.f32 %v668_v61, %v414_v33 }
 0x1f7   :  { %v769_v47 = vmax.f32 %v732_v27, 0.0  ;;  %v765_v61 = vmax.f32 %v722_v19, 0.0  ;;  %v489_v45 = vpop.permute.xlu1 %488 }
 0x1f8   :  { %v744_v63 = vmax.f32 %v669_v62, 0.0 }
 0x1fa   :  { %v2014_v40 = vpack.c.bf16 %v744_v63, %v743_v32  ;;  %v763_v32 = vmax.f32 %v717_v41, 0.0 }
 0x1fb   :  { %v723_v43 = vpop.f32.mrf.mxu2 }
 0x1fc   :  { %v733_v1 = vpop.f32.mrf.mxu3 }
 0x1fd   :  { %v671_v44 = vpop.f32.mrf.mxu1  ;;  %v734_v16 = vadd.f32 %v733_v1, %v1967_v13  ;;  %v724_v13 = vadd.f32 %v723_v43, %v2000_v30  ;;  %v494_v43 = vpop.permute.xlu2 %493 }
 0x1fe   :  { %v672_v46 = vadd.f32 %v671_v44, %v419_v36 }
 0x1ff   :  { %v770_v39 = vmax.f32 %v734_v16, 0.0  ;;  %v766_v59 = vmax.f32 %v724_v13, 0.0 }
 0x200   :  { %710 = vmatmul.bf16.gmra.mxu1 %v1454_v50  ;;  %v745_v6 = vmax.f32 %v672_v46, 0.0 }
 0x201   :  { %v801_v30 = vpack.c.bf16 %v766_v59, %v765_v61  ;;  %v1460_v61 = vld [vmem:[%s2172_s5 + $0x4] sm:$0xf] }
 0x204   :  { %v736_v0 = vpop.f32.mrf.mxu3 }
 0x205   :  { %v673_v3 = vpop.f32.mrf.mxu1  ;;  %v737_v10 = vadd.f32 %v736_v0, %v549_v24  ;;  %v484_v52 = vpop.permute.xlu2 %483 }
 0x206   :  { %v674_v4 = vadd.f32 %v673_v3, %v424_v49 }
 0x207   :  { %v771_v33 = vmax.f32 %v737_v10, 0.0 }
 0x208   :  { %v746_v7 = vmax.f32 %v674_v4, 0.0 }
 0x20a   :  { %v2019_v8 = vpack.c.bf16 %v746_v7, %v745_v6 }
 0x20c   :  { %v738_v12 = vpop.f32.mrf.mxu3 }
 0x20d   :  { %v739_v20 = vadd.f32 %v738_v12, %v1976_v17  ;;  %v676_v21 = vpop.f32.mrf.mxu1  ;;  %v803_v17 = vpack.c.bf16 %v770_v39, %v769_v47  ;;  %v1463_v47 = vld [vmem:[%s2172_s5 + $0x14] sm:$0xf0] }
 0x20e   :  { %v677_v24 = vadd.f32 %v676_v21, %v1985_v22  ;;  %v764_v22 = vmax.f32 %v719_v54, 0.0 }
 0x20f   :  { %v772_v34 = vmax.f32 %v739_v20, 0.0 }
 0x210   :  { %v747_v53 = vmax.f32 %v677_v24, 0.0  ;;  %v800_v63 = vpack.c.bf16 %v764_v22, %v763_v32  ;;  %v1375_v22 = vld [vmem:[%s2172_s5 + $0x8] sm:$0xf0]  ;;  %v1389_v32 = vld [vmem:[%s2172_s5 + $0x20] sm:$0xf] }
 0x211   :  { %v804_v42 = vpack.c.bf16 %v772_v34, %v771_v33 }
 0x213   :  { %1030 = vmatpush.bf16.msrb.mxu3 %v804_v42 }
 0x215   :  { %v678_v49 = vpop.f32.mrf.mxu1 }
 0x216   :  { %v679_v55 = vadd.f32 %v678_v49, %v434_v57 }
 0x217   :  { %1031 = vmatpush.bf16.msrb.mxu3 %v803_v17 }
 0x218   :  { %v748_v38 = vmax.f32 %v679_v55, 0.0 }
 0x21a   :  { %v792_v15 = vpack.c.bf16 %v748_v38, %v747_v53 }
 0x21b   :  { %1032 = vmatpush.bf16.msrb.mxu3 %v802_v60 }
 0x21d   :  { %v681_v62 = vpop.f32.mrf.mxu1 }
 0x21f   :  { %1033 = vmatpush.bf16.msrb.mxu3 %v801_v30  ;;  %v1378_v30 = vor.u32 %v1460_v61, %v1375_v22 }
 0x223   :  { %1034 = vmatpush.bf16.msrb.mxu3 %v800_v63  ;;  %v1465_v63 = vld [vmem:[%s2172_s5 + $0x24] sm:$0xf0] }
 0x225   :  { %v683_v56 = vpop.f32.mrf.mxu1 }
 0x22d   :  { %v686_v57 = vpop.f32.mrf.mxu1 }
 0x22e   :  { %v687_v7 = vadd.f32 %v686_v57, %v2002_v31  ;;  %v1462_v57 = vld [vmem:[%s2172_s5 + $0x14] sm:$0xf] }
 0x235   :  { %v688_v1 = vpop.f32.mrf.mxu1 }
 0x236   :  { %v689_v4 = vadd.f32 %v688_v1, %v1987_v23  ;;  %v1383_v1 = vld [vmem:[%s2172_s5 + $0x18] sm:$0xf0] }
 0x238   :  { %v752_v16 = vmax.f32 %v689_v4, 0.0  ;;  %v1466_v4 = vld [vmem:[%s2172_s5 + $0x34] sm:$0xf] }
 0x23d   :  { %v691_v50 = vpop.f32.mrf.mxu1 }
 0x23e   :  { %v692_v46 = vadd.f32 %v691_v50, %v1962_v11  ;;  %v1386_v50 = vor.u32 %v1462_v57, %v1383_v1 }
 0x240   :  { %v753_v10 = vmax.f32 %v692_v46, 0.0  ;;  %v1405_v46 = vld [vmem:[%s2172_s5 + $0x40] sm:$0xf] }
 0x245   :  { %v693_v44 = vpop.f32.mrf.mxu1 }
 0x246   :  { %v694_v37 = vadd.f32 %v693_v44, %v1996_v28  ;;  %v682_v28 = vadd.f32 %v681_v62, %v1991_v26  ;;  %v1461_v26 = vld [vmem:[%s2172_s5 + $0x4] sm:$0xf0]  ;;  %v1397_v44 = vld [vmem:[%s2172_s5 + $0x30] sm:$0xf] }
 0x248   :  { %v754_v5 = vmax.f32 %v694_v37, 0.0  ;;  %v749_v27 = vmax.f32 %v682_v28, 0.0  ;;  %v1391_v37 = vld [vmem:[%s2172_s5 + $0x28] sm:$0xf0]  ;;  %v1421_v28 = vld [vmem:[%s2172_s5 + $0x60] sm:$0xf] }
 0x24a   :  { %v795_v20 = vpack.c.bf16 %v754_v5, %v753_v10  ;;  %v1399_v5 = vld [vmem:[%s2172_s5 + $0x38] sm:$0xf0]  ;;  %v1471_v10 = vld [vmem:[%s2172_s5 + $0x54] sm:$0xf0] }
 0x24d   :  { %v696_v25 = vpop.f32.mrf.mxu1 }
 0x24e   :  { %v697_v2 = vadd.f32 %v696_v25, %v1969_v14  ;;  %v684_v14 = vadd.f32 %v683_v56, %v1978_v18  ;;  %v1373_v18 = vld [vmem:[%s2172_s5] sm:$0xf]  ;;  %v1390_v56 = vor.u32 %v1465_v63, %v1389_v32  ;;  %v1467_v25 = vld [vmem:[%s2172_s5 + $0x34] sm:$0xf0] }
 0x24f   :  { %v1374_v39 = vor.u32 %v1461_v26, %v1373_v18  ;;  %v1472_v26 = vld [vmem:[%s2172_s5 + $0x64] sm:$0xf] }
 0x250   :  { %v755_v0 = vmax.f32 %v697_v2, 0.0  ;;  %v750_v11 = vmax.f32 %v684_v14, 0.0  ;;  %v1398_v2 = vor.u32 %v1467_v25, %v1397_v44  ;;  %v1468_v14 = vld [vmem:[%s2172_s5 + $0x44] sm:$0xf] }
 0x252   :  { %v793_v33 = vpack.c.bf16 %v750_v11, %v749_v27  ;;  %v1415_v27 = vld [vmem:[%s2172_s5 + $0x58] sm:$0xf0] }
 0x255   :  { %v698_v36 = vpop.f32.mrf.mxu1 }
 0x256   :  { %v699_v58 = vadd.f32 %v698_v36, %v1957_v9  ;;  %v751_v9 = vmax.f32 %v687_v7, 0.0  ;;  %v1464_v36 = vld [vmem:[%s2172_s5 + $0x24] sm:$0xf]  ;;  %v1413_v7 = vld [vmem:[%s2172_s5 + $0x50] sm:$0xf] }
 0x258   :  { %v756_v3 = vmax.f32 %v699_v58, 0.0  ;;  %v794_v21 = vpack.c.bf16 %v752_v16, %v751_v9  ;;  %v1394_v58 = vor.u32 %v1464_v36, %v1391_v37  ;;  %v1407_v16 = vld [vmem:[%s2172_s5 + $0x48] sm:$0xf0]  ;;  %v1473_v9 = vld [vmem:[%s2172_s5 + $0x64] sm:$0xf0] }
 0x259   :  { %v1422_v11 = vor.u32 %v1473_v9, %v1421_v28 }
 0x25a   :  { %v796_v6 = vpack.c.bf16 %v756_v3, %v755_v0  ;;  %v1469_v0 = vld [vmem:[%s2172_s5 + $0x44] sm:$0xf0] }
 0x25b   :  { %v1406_v3 = vor.u32 %v1469_v0, %v1405_v46 }
 0x25c   :  { %981 = vmatpush.bf16.msrb.mxu2 %v796_v6  ;;  %v1402_v6 = vor.u32 %v1466_v4, %v1399_v5 }
 0x25d   :  { %v701_v12 = vpop.f32.mrf.mxu1 }
 0x260   :  { %982 = vmatpush.bf16.msrb.mxu2 %v795_v20  ;;  %v1410_v20 = vor.u32 %v1468_v14, %v1407_v16 }
 0x264   :  { %983 = vmatpush.bf16.msrb.mxu2 %v794_v21  ;;  %v1470_v21 = vld [vmem:[%s2172_s5 + $0x54] sm:$0xf] }
 0x265   :  { %v703_v23 = vpop.f32.mrf.mxu1 }
 0x266   :  { %v704_v19 = vadd.f32 %v703_v23, %v484_v52  ;;  %v1418_v23 = vor.u32 %v1470_v21, %v1415_v27 }
 0x268   :  { %984 = vmatpush.bf16.msrb.mxu2 %v793_v33  ;;  %v758_v60 = vmax.f32 %v704_v19, 0.0  ;;  %v1429_v33 = vld [vmem:[%s2172_s5 + $0x70] sm:$0xf] }
 0x26c   :  { %985 = vmatpush.bf16.msrb.mxu2 %v792_v15 }
 0x26d   :  { %v706_v31 = vpop.f32.mrf.mxu1 }
 0x26e   :  { %v707_v17 = vadd.f32 %v706_v31, %v489_v45  ;;  %v1475_v31 = vld [vmem:[%s2172_s5 + $0x74] sm:$0xf0] }
 0x26f   :  { %v1430_v18 = vor.u32 %v1475_v31, %v1429_v33 }
 0x270   :  { %986 = vmatpush.bf16.msrb.mxu2 %v2019_v8  ;;  %v759_v59 = vmax.f32 %v707_v17, 0.0 }
 0x274   :  { %987 = vmatpush.bf16.msrb.mxu2 %v2014_v40  ;;  %v1381_v40 = vld [vmem:[%s2172_s5 + $0x10] sm:$0xf] }
 0x275   :  { %v708_v34 = vpop.f32.mrf.mxu1  ;;  %v1382_v49 = vor.u32 %v1463_v47, %v1381_v40  ;;  %v1431_v40 = vld [vmem:[%s2172_s5 + $0x78] sm:$0xf0] }
 0x276   :  { %v709_v48 = vadd.f32 %v708_v34, %v494_v43  ;;  %v1423_v34 = vld [vmem:[%s2172_s5 + $0x68] sm:$0xf0] }
 0x278   :  { %988 = vmatpush.bf16.msrb.mxu2 %v2009_v51  ;;  %v760_v53 = vmax.f32 %v709_v48, 0.0 }
 0x27a   :  { %v798_v15 = vpack.c.bf16 %v760_v53, %v759_v59 }
 0x27b   :  { %989 = vmatmul.bf16.vlgmr.msrb.gmra.mxu2 %v1374_v39  ;;  %v824_v39 = vpop.permute.xlu0 %823 }
 0x27d   :  { %v711_v42 = vpop.f32.mrf.mxu1 }
 0x27e   :  { %v712_v8 = vadd.f32 %v711_v42, %v1998_v29  ;;  %v479_v29 = vpop.permute.xlu1 %478  ;;  %v834_v42 = vpop.permute.xlu2 %833 }
 0x27f   :  { %v702_v54 = vadd.f32 %v701_v12, %v479_v29  ;;  %v1414_v12 = vor.u32 %v1471_v10, %v1413_v7 }
 0x280   :  { %v761_v51 = vmax.f32 %v712_v8, 0.0  ;;  %v1474_v8 = vld [vmem:[%s2172_s5 + $0x74] sm:$0xf] }
 0x281   :  { %v757_v41 = vmax.f32 %v702_v54, 0.0  ;;  %v1434_v47 = vor.u32 %v1474_v8, %v1431_v40 }
 0x283   :  { %v797_v62 = vpack.c.bf16 %v758_v60, %v757_v41 }
 0x285   :  { %v713_v24 = vpop.f32.mrf.mxu1 }
 0x286   :  { %v714_v13 = vadd.f32 %v713_v24, %v504_v35  ;;  %v1426_v35 = vor.u32 %v1472_v26, %v1423_v34  ;;  %v829_v43 = vpop.permute.xlu1 %828  ;;  %v839_v24 = vpop.permute.xlu0 %838 }
 0x288   :  { %v762_v55 = vmax.f32 %v714_v13, 0.0  ;;  %v2137_v13 = vpop.permute.xlu2 %848 }
 0x28a   :  { %v799_v38 = vpack.c.bf16 %v762_v55, %v761_v51 }
 0x28b   :  { %994 = vmatmul.bf16.gmra.mxu2 %v1382_v49 }
 0x28c   :  { %1035 = vmatpush.bf16.msrb.mxu3 %v799_v38 }
 0x28e   :  { %v844_v49 = vpop.permute.xlu1 %843  ;;  %v2139_v51 = vpop.permute.xlu0 %853 }
 0x290   :  { %1036 = vmatpush.bf16.msrb.mxu3 %v798_v15  ;;  %v2141_v55 = vpop.permute.xlu2 %863 }
 0x294   :  { %1037 = vmatpush.bf16.msrb.mxu3 %v797_v62 }
 0x296   :  { %v2143_v52 = vpop.permute.xlu1 %858  ;;  %v2145_v38 = vpop.permute.xlu0 %868 }
 0x297   :  { %1038 = vmatmul.bf16.vlgmr.msrb.gmra.mxu3 %v1378_v30 }
 0x298   :  { %v2147_v59 = vpop.permute.xlu2 %878 }
 0x29b   :  { %999 = vmatmul.bf16.gmra.mxu2 %v1390_v56 }
 0x29e   :  { %v2149_v60 = vpop.permute.xlu1 %873  ;;  %v2151_v30 = vpop.permute.xlu0 %883 }
 0x2a0   :  { %v1119_v63 = vpop.permute.xlu2 %1118 }
 0x2a6   :  { %v1114_v56 = vpop.permute.xlu1 %1113 }
 0x2a7   :  { %1043 = vmatmul.bf16.gmra.mxu3 %v1386_v50 }
 0x2ab   :  { %1004 = vmatmul.bf16.gmra.mxu2 %v1398_v2 }
 0x2ae   :  { %v1129_v10 = vpop.permute.xlu1 %1128 }
 0x2b6   :  { %v1144_v40 = vpop.permute.xlu1 %1143 }
 0x2b7   :  { %1048 = vmatmul.bf16.gmra.mxu3 %v1394_v58  ;;  %v1124_v58 = vpop.permute.xlu0 %1123 }
 0x2bb   :  { %1009 = vmatmul.bf16.gmra.mxu2 %v1406_v3 }
 0x2c7   :  { %1053 = vmatmul.bf16.gmra.mxu3 %v1402_v6 }
 0x2cb   :  { %1014 = vmatmul.bf16.gmra.mxu2 %v1414_v12 }
 0x2d7   :  { %1058 = vmatmul.bf16.gmra.mxu3 %v1410_v20 }
 0x2db   :  { %1019 = vmatmul.bf16.gmra.mxu2 %v1422_v11  ;;  %v1134_v11 = vpop.permute.xlu2 %1133 }
 0x2e7   :  { %1063 = vmatmul.bf16.gmra.mxu3 %v1418_v23 }
 0x2eb   :  { %1024 = vmatmul.bf16.gmra.mxu2 %v1430_v18 }
 0x2f7   :  { %1068 = vmatmul.bf16.gmra.mxu3 %v1426_v35 }
 0x2fe   :  { %v990_v45 = vpop.f32.mrf.mxu2 }
 0x2ff   :  { %v991_v53 = vadd.f32 %v990_v45, %v824_v39  ;;  %v1139_v45 = vpop.permute.xlu0 %1138 }
 0x306   :  { %v992_v48 = vpop.f32.mrf.mxu2 }
 0x307   :  { %1073 = vmatmul.bf16.gmra.mxu3 %v1434_v47  ;;  %v993_v41 = vadd.f32 %v992_v48, %v829_v43 }
 0x30e   :  { %v995_v17 = vpop.f32.mrf.mxu2 }
 0x30f   :  { %v996_v50 = vadd.f32 %v995_v17, %v834_v42 }
 0x316   :  { %v997_v19 = vpop.f32.mrf.mxu2 }
 0x317   :  { %v998_v0 = vadd.f32 %v997_v19, %v839_v24  ;;  %v1149_v24 = vpop.permute.xlu2 %1148  ;;  %v1159_v19 = vpop.permute.xlu1 %1158 }
 0x31a   :  { %v1039_v29 = vpop.f32.mrf.mxu3 }
 0x31b   :  { %v1040_v54 = vadd.f32 %v1039_v29, %v991_v53 }
 0x31d   :  { %v1079_v22 = vmax.f32 %v1040_v54, 0.0 }
 0x31e   :  { %v1000_v15 = vpop.f32.mrf.mxu2 }
 0x31f   :  { %v1191_v57 = vmul.f32 %v1114_v56, %v1079_v22  ;;  %v1001_v14 = vadd.f32 %v1000_v15, %v844_v49  ;;  %v1154_v49 = vpop.permute.xlu0 %1153  ;;  %v889_v22 = vpop.permute.xlu2 %888 }
 0x322   :  { %v1041_v61 = vpop.f32.mrf.mxu3 }
 0x323   :  { %v1042_v62 = vadd.f32 %v1041_v61, %v993_v41 }
 0x325   :  { %v1080_v32 = vmax.f32 %v1042_v62, 0.0 }
 0x326   :  { %v1002_v25 = vpop.f32.mrf.mxu2 }
 0x327   :  { %v1192_v1 = vmul.f32 %v1119_v63, %v1080_v32  ;;  %v1003_v17 = vadd.f32 %v1002_v25, %v2137_v13  ;;  %v1164_v56 = vpop.permute.xlu0 %1163 }
 0x329   :  { %v1207_v44 = vadd.f32 %v1192_v1, %v1191_v57 }
 0x32a   :  { %v1044_v2 = vpop.f32.mrf.mxu3 }
 0x32b   :  { %v1045_v36 = vadd.f32 %v1044_v2, %v996_v50  ;;  %v894_v2 = vpop.permute.xlu1 %893 }
 0x32d   :  { %v1081_v37 = vmax.f32 %v1045_v36, 0.0 }
 0x32e   :  { %v1005_v6 = vpop.f32.mrf.mxu2 }
 0x32f   :  { %v1193_v46 = vmul.f32 %v1124_v58, %v1081_v37  ;;  %v1006_v53 = vadd.f32 %v1005_v6, %v2139_v51  ;;  %v1169_v6 = vpop.permute.xlu2 %1168 }
 0x331   :  { %v1208_v3 = vadd.f32 %v1207_v44, %v1193_v46 }
 0x332   :  { %v1046_v4 = vpop.f32.mrf.mxu3 }
 0x333   :  { %v1047_v5 = vadd.f32 %v1046_v4, %v998_v0 }
 0x335   :  { %v1082_v7 = vmax.f32 %v1047_v5, 0.0 }
 0x336   :  { %v1007_v21 = vpop.f32.mrf.mxu2 }
 0x337   :  { %v1194_v12 = vmul.f32 %v1129_v10, %v1082_v7  ;;  %v1008_v54 = vadd.f32 %v1007_v21, %v2143_v52 }
 0x339   :  { %v1209_v16 = vadd.f32 %v1208_v3, %v1194_v12 }
 0x33a   :  { %v1049_v20 = vpop.f32.mrf.mxu3 }
 0x33b   :  { %v1050_v28 = vadd.f32 %v1049_v20, %v1001_v14 }
 0x33d   :  { %v1083_v9 = vmax.f32 %v1050_v28, 0.0 }
 0x33e   :  { %v1010_v31 = vpop.f32.mrf.mxu2 }
 0x33f   :  { %v1195_v27 = vmul.f32 %v1134_v11, %v1083_v9  ;;  %v1011_v63 = vadd.f32 %v1010_v31, %v2141_v55 }
 0x341   :  { %v1210_v23 = vadd.f32 %v1209_v16, %v1195_v27  ;;  %v899_v16 = vpop.permute.xlu0 %898 }
 0x342   :  { %v1051_v33 = vpop.f32.mrf.mxu3 }
 0x343   :  { %v1052_v29 = vadd.f32 %v1051_v33, %v1003_v17 }
 0x345   :  { %v1084_v62 = vmax.f32 %v1052_v29, 0.0 }
 0x346   :  { %v1012_v26 = vpop.f32.mrf.mxu2 }
 0x347   :  { %v1013_v1 = vadd.f32 %v1012_v26, %v2145_v38  ;;  %v1196_v13 = vmul.f32 %v1139_v45, %v1084_v62  ;;  %v1179_v45 = vpop.permute.xlu2 %1178 }
 0x349   :  { %v1211_v0 = vadd.f32 %v1210_v23, %v1196_v13 }
 0x34a   :  { %v1054_v18 = vpop.f32.mrf.mxu3 }
 0x34b   :  { %v1055_v15 = vadd.f32 %v1054_v18, %v1006_v53 }
 0x34d   :  { %v1085_v57 = vmax.f32 %v1055_v15, 0.0 }
 0x34e   :  { %v1015_v39 = vpop.f32.mrf.mxu2 }
 0x34f   :  { %v1016_v51 = vadd.f32 %v1015_v39, %v2149_v60  ;;  %v1197_v52 = vmul.f32 %v1144_v40, %v1085_v57  ;;  %v1229_v57 = vstv %s2175_s8  ;;  %s1258_s8 = sshll.u32 %s2176_s9, 4  ;;  %s1259_s8 = int_to_ptr.hbm [resolvable:$true] %s1258_s8 }
 0x351   :  { %v1212_v7 = vadd.f32 %v1211_v0, %v1197_v52 }
 0x352   :  { %v1056_v34 = vpop.f32.mrf.mxu3 }
 0x353   :  { %v1057_v32 = vadd.f32 %v1056_v34, %v1008_v54 }
 0x355   :  { %v1086_v44 = vmax.f32 %v1057_v32, 0.0 }
 0x356   :  { %v1017_v43 = vpop.f32.mrf.mxu2 }
 0x357   :  { %v1018_v37 = vadd.f32 %v1017_v43, %v2147_v59  ;;  %v1198_v3 = vmul.f32 %v1149_v24, %v1086_v44  ;;  %v1184_v24 = vpop.permute.xlu0 %1183 }
 0x359   :  { %v1213_v20 = vadd.f32 %v1212_v7, %v1198_v3 }
 0x35a   :  { %v1059_v35 = vpop.f32.mrf.mxu3 }
 0x35b   :  { %v1060_v50 = vadd.f32 %v1059_v35, %v1011_v63 }
 0x35d   :  { %v1087_v58 = vmax.f32 %v1060_v50, 0.0 }
 0x35e   :  { %v1020_v47 = vpop.f32.mrf.mxu2 }
 0x35f   :  { %v1021_v4 = vadd.f32 %v1020_v47, %v2151_v30  ;;  %v1199_v10 = vmul.f32 %v1154_v49, %v1087_v58  ;;  %v1174_v30 = vpop.permute.xlu1 %1173 }
 0x361   :  { %v1214_v27 = vadd.f32 %v1213_v20, %v1199_v10 }
 0x362   :  { %v1061_v42 = vpop.f32.mrf.mxu3 }
 0x363   :  { %v1062_v25 = vadd.f32 %v1061_v42, %v1013_v1 }
 0x365   :  { %v1088_v5 = vmax.f32 %v1062_v25, 0.0 }
 0x366   :  { %v1022_v41 = vpop.f32.mrf.mxu2 }
 0x367   :  { %v1023_v12 = vadd.f32 %v1022_v41, %v889_v22  ;;  %v1200_v28 = vmul.f32 %v1159_v19, %v1088_v5  ;;  %v1189_v54 = vpop.permute.xlu1 %1188 }
 0x369   :  { %v1215_v18 = vadd.f32 %v1214_v27, %v1200_v28 }
 0x36a   :  { %v1064_v8 = vpop.f32.mrf.mxu3 }
 0x36b   :  { %v1065_v46 = vadd.f32 %v1064_v8, %v1016_v51 }
 0x36d   :  { %v1089_v60 = vmax.f32 %v1065_v46, 0.0 }
 0x36e   :  { %v1025_v55 = vpop.f32.mrf.mxu2 }
 0x36f   :  { %v1026_v9 = vadd.f32 %v1025_v55, %v894_v2  ;;  %v1201_v23 = vmul.f32 %v1164_v56, %v1089_v60 }
 0x371   :  { %v1216_v39 = vadd.f32 %v1215_v18, %v1201_v23 }
 0x372   :  { %v1066_v48 = vpop.f32.mrf.mxu3 }
 0x373   :  { %v1067_v38 = vadd.f32 %v1066_v48, %v1018_v37 }
 0x375   :  { %v1090_v59 = vmax.f32 %v1067_v38, 0.0 }
 0x376   :  { %v1027_v35 = vpop.f32.mrf.mxu2 }
 0x377   :  { %v1202_v26 = vmul.f32 %v1169_v6, %v1090_v59  ;;  %v1028_v40 = vadd.f32 %v1027_v35, %v899_v16 }
 0x379   :  { %v1217_v8 = vadd.f32 %v1216_v39, %v1202_v26 }
 0x37a   :  { %v1069_v61 = vpop.f32.mrf.mxu3 }
 0x37b   :  { %v1070_v14 = vadd.f32 %v1069_v61, %v1021_v4 }
 0x37d   :  { %v1091_v33 = vmax.f32 %v1070_v14, 0.0 }
 0x37f   :  { %v1203_v42 = vmul.f32 %v1174_v30, %v1091_v33 }
 0x381   :  { %v1218_v49 = vadd.f32 %v1217_v8, %v1203_v42 }
 0x382   :  { %v1071_v36 = vpop.f32.mrf.mxu3 }
 0x383   :  { %v1072_v11 = vadd.f32 %v1071_v36, %v1023_v12 }
 0x385   :  { %v1092_v34 = vmax.f32 %v1072_v11, 0.0 }
 0x387   :  { %v1204_v47 = vmul.f32 %v1179_v45, %v1092_v34 }
 0x389   :  { %v1219_v53 = vadd.f32 %v1218_v49, %v1204_v47 }
 0x38a   :  { %v1074_v21 = vpop.f32.mrf.mxu3 }
 0x38b   :  { %v1075_v31 = vadd.f32 %v1074_v21, %v1026_v9 }
 0x38d   :  { %v1093_v43 = vmax.f32 %v1075_v31, 0.0 }
 0x38f   :  { %v1205_v17 = vmul.f32 %v1184_v24, %v1093_v43 }
 0x391   :  { %v1220_v15 = vadd.f32 %v1219_v53, %v1205_v17 }
 0x392   :  { %v1076_v48 = vpop.f32.mrf.mxu3 }
 0x393   :  { %v1077_v19 = vadd.f32 %v1076_v48, %v1028_v40 }
 0x395   :  { %v1094_v29 = vmax.f32 %v1077_v19, 0.0 }
 0x397   :  { %v1206_v41 = vmul.f32 %v1189_v54, %v1094_v29 }
 0x399   :  { %v1221_v61 = vadd.f32 %v1220_v15, %v1206_v41 }
 0x39b   :  { %v1222_v22 = vrot.slane %v1221_v61, 4 }
 0x39d   :  { %v1223_v62 = vadd.f32 %v1222_v22, %v1221_v61 }
 0x39f   :  { %v1224_v32 = vrot.slane %v1223_v62, 2 }
 0x3a1   :  { %v1225_v63 = vadd.f32 %v1224_v32, %v1223_v62 }
 0x3a3   :  { %v1226_v56 = vrot.slane %v1225_v63, 1 }
 0x3a5   :  { %v1227_v1 = vadd.f32 %v1226_v56, %v1225_v63 }
 0x3a7   :  { %v1230_v50 = vadd.f32 %v1229_v57, %v1227_v1 }
 0x3a9   :  { %v1435_v13 = vmul.f32 -1.442695, %v1230_v50 }
 0x3ab   :  { %1497 = vpow2.f32 %v1435_v13 }
 0x3b1   :  { %v1498_v44 = vpop.eup %1497 }
 0x3b2   :  { %v1234_v51 = vadd.f32 1.0, %v1498_v44 }
 0x3b4   :  { %1499 = vrcp.f32 %v1234_v51  ;;  %v1246_v36 = vand.u32 2147483648, %v1234_v51  ;;  %v1244_v58 = vand.u32 2147483647, %v1234_v51  ;;  %vm1240_vm2 = vweird.f32 %v1234_v51 }
 0x3b6   :  { %v1247_v0 = vor.u32 1.1754944e-38, %v1246_v36  ;;  %vm1245_vm4 = vcmp.eq.f32.partialorder %v1244_v58, 8.507059e+37 }
 0x3ba   :  { %v1500_v25 = vpop.eup %1499 }
 0x3bb   :  { %v1236_v2 = vmul.f32 %v1500_v25, %v1234_v51  ;;  %vm1241_vm1 = vweird.f32 %v1500_v25 }
 0x3bc   :  { %vm1242_vm3 = vmor %vm1240_vm2, %vm1241_vm1 }
 0x3bd   :  { %v1237_v52 = vsub.f32 1.0, %v1236_v2 }
 0x3bf   :  { %v1238_v37 = vmul.f32 %v1500_v25, %v1237_v52 }
 0x3c1   :  { %v1239_v46 = vadd.f32 %v1500_v25, %v1238_v37 }
 0x3c3   :  { %v1243_v3 = vsel %vm1242_vm3, %v1500_v25, %v1239_v46 }
 0x3c4   :  { %v1248_v55 = vsel %vm1245_vm4, %v1247_v0, %v1243_v3 }
 0x3c5   :  { %1250 = vst [vmem:[#allocation3] sm:$0x1] %v1248_v55 }
 0x3c6   :  { %1261 = dma.vmem_to_hbm [thread:$0]  %s1257_s21, 16, %s1259_s8, [#allocation4]  }
 0x3c7   :  { %1525 = dma.done.wait [#allocation4], 16  }
 0x3c8   :  { %1526 = vsyncadd [#allocation4], 4294967280 }
 0x3c9   :  { %1266 = vsyncpa [#allocation4], 1 }

</bundles_post_ra>
